<compile_context>
chip_gen: v7x
topology: tpu7x:2x2x1
jax: 0.10.0
libtpu: 0.0.40
codegen_flags: <defaults>
</compile_context>

<pallas_src>
import jax
import jax.numpy as jnp
from jax.experimental import pallas as pl
from jax.experimental.pallas import tpu as pltpu


def _disc_digits_kernel(xT_ref, w1_ref, b1_ref, w2_ref, b2_ref, w3_ref, b3_ref, o_ref):
    xT = xT_ref[...]                                                  # (inp, Bb)

    # Linear(inp, 24) + ReLU   -> (24, Bb)
    h1 = jnp.dot(w1_ref[...], xT, preferred_element_type=jnp.float32) + b1_ref[...]
    h1 = jnp.maximum(h1, 0.0)

    # Linear(24, 12) + ReLU    -> (12, Bb)
    h2 = jnp.dot(w2_ref[...], h1, preferred_element_type=jnp.float32) + b2_ref[...]
    h2 = jnp.maximum(h2, 0.0)

    # Linear(12, 1)            -> (1, Bb)
    logits = jnp.dot(w3_ref[...], h2, preferred_element_type=jnp.float32) + b3_ref[...]

    # Sigmoid (exp runs on the EUP slot)
    o_ref[...] = jax.nn.sigmoid(logits)


def disc_digits_forward(x, params, constant=1.0, adaption=False, block_b=8192):
    """Pallas-backed forward of disc_digits.

    `adaption`/`constant` only affect gradients (grad_reverse) in the original
    module; the forward pass is identity there.
    """
    # TODO(synk): grad_reverse custom backward (gradient reversal) is not implemented;
    # it would need a jax.custom_vjp wrapper outside the kernel. Forward is exact.
    w1, b1, w2, b2, w3, b3 = params            # w: (out, in), b: (out, 1)
    B, inp = x.shape

    # Put batch on the lane axis (single small transpose; everything downstream
    # is lane-dense and the output transposes back for free).
    xT = x.T                                   # (inp, B)

    if B <= block_b:
        # Single full-extent block: no divisibility constraint, no padding copy.
        bb, grid_b, b_pad = B, 1, B
    else:
        bb = block_b                           # multiple of 128 (lane-aligned)
        grid_b = pl.cdiv(B, bb)
        b_pad = grid_b * bb
        if b_pad != B:
            xT = jnp.pad(xT, ((0, 0), (0, b_pad - B)))

    const_spec = lambda a: pl.BlockSpec(a.shape, lambda i: (0, 0))    # grid-resident

    outT = pl.pallas_call(
        _disc_digits_kernel,
        out_shape=jax.ShapeDtypeStruct((1, b_pad), jnp.float32),
        grid=(grid_b,),
        in_specs=[
            pl.BlockSpec((inp, bb), lambda i: (0, i)),
            const_spec(w1), const_spec(b1),
            const_spec(w2), const_spec(b2),
            const_spec(w3), const_spec(b3),
        ],
        out_specs=pl.BlockSpec((1, bb), lambda i: (0, i)),
        compiler_params=pltpu.CompilerParams(
            dimension_semantics=("parallel",),
        ),
    )(xT, w1, b1, w2, b2, w3, b3)

    # Strip batch padding; (1, B) -> (B, 1) is a layout-preserving reshape.
    return outT[:, :B].reshape(B, 1)


def init_params(key, inp=4):
    """Deterministic init mimicking PyTorch nn.Linear default:
    U(-1/sqrt(fan_in), 1/sqrt(fan_in)) for both weight and bias.
    Weights are (out, in) = torch layout; biases are (out, 1)."""
    dims = [(inp, 24), (24, 12), (12, 1)]
    params = []
    for (fan_in, fan_out) in dims:
        key, kw, kb = jax.random.split(key, 3)
        bound = 1.0 / jnp.sqrt(float(fan_in))
        w = jax.random.uniform(kw, (fan_out, fan_in), jnp.float32, -bound, bound)
        b = jax.random.uniform(kb, (fan_out, 1), jnp.float32, -bound, bound)
        params += [w, b]
    return tuple(params)


def _reference(x, params):
    w1, b1, w2, b2, w3, b3 = params
    h1 = jnp.maximum(x @ w1.T + b1.T, 0.0)
    h2 = jnp.maximum(h1 @ w2.T + b2.T, 0.0)
    return jax.nn.sigmoid(h2 @ w3.T + b3.T)


if __name__ == "__main__":
    key = jax.random.PRNGKey(0)
    k_x, k_p = jax.random.split(key)

    inp = 4
    batch = 8
    x = jax.random.normal(k_x, (batch, inp), dtype=jnp.float32)
    params = init_params(k_p, inp=inp)

    out = disc_digits_forward(x, params, constant=1.0, adaption=False)
    out = jax.block_until_ready(out)

    assert out.shape == (batch, 1)
    assert bool(jnp.all((out >= 0.0) & (out <= 1.0)))
    assert jnp.allclose(out, _reference(x, params), atol=1e-5, rtol=1e-5)

    # Batch not a multiple of 128 but fitting one block (full-extent, no padding).
    x2 = jax.random.normal(jax.random.PRNGKey(1), (300, inp), dtype=jnp.float32)
    out2 = jax.block_until_ready(disc_digits_forward(x2, params))
    assert out2.shape == (300, 1)
    assert jnp.allclose(out2, _reference(x2, params), atol=1e-5, rtol=1e-5)

    # Force the multi-block + tail-padding path with a small block size.
    out3 = jax.block_until_ready(disc_digits_forward(x2, params, block_b=128))
    assert out3.shape == (300, 1)
    assert jnp.allclose(out3, _reference(x2, params), atol=1e-5, rtol=1e-5)

    print("KERNEL_OK")
</pallas_src>

<mosaic_0001>
module attributes {stable_mosaic.version = 11 : i64} {
  func.func @_disc_digits_kernel(%arg0: i32, %arg1: memref<4x8xf32, #tpu.memory_space<vmem>>, %arg2: memref<24x4xf32, #tpu.memory_space<vmem>>, %arg3: memref<24x1xf32, #tpu.memory_space<vmem>>, %arg4: memref<12x24xf32, #tpu.memory_space<vmem>>, %arg5: memref<12x1xf32, #tpu.memory_space<vmem>>, %arg6: memref<1x12xf32, #tpu.memory_space<vmem>>, %arg7: memref<1x1xf32, #tpu.memory_space<vmem>>, %arg8: memref<1x8xf32, #tpu.memory_space<vmem>>) attributes {dimension_semantics = [#tpu.dimension_semantics<parallel>], iteration_bounds = array<i64: 1>, scalar_prefetch = 0 : i64, scratch_operands = 0 : i64, tpu.core_type = #tpu.core_type<tc>, window_params = [{transform_indices = @transform_0, window_bounds = array<i64: 4, 8>}, {pipeline_mode = #tpu.pipeline_mode<synchronous>, transform_indices = @transform_1, window_bounds = array<i64: 24, 4>}, {pipeline_mode = #tpu.pipeline_mode<synchronous>, transform_indices = @transform_2, window_bounds = array<i64: 24, 1>}, {pipeline_mode = #tpu.pipeline_mode<synchronous>, transform_indices = @transform_3, window_bounds = array<i64: 12, 24>}, {pipeline_mode = #tpu.pipeline_mode<synchronous>, transform_indices = @transform_4, window_bounds = array<i64: 12, 1>}, {pipeline_mode = #tpu.pipeline_mode<synchronous>, transform_indices = @transform_5, window_bounds = array<i64: 1, 12>}, {pipeline_mode = #tpu.pipeline_mode<synchronous>, transform_indices = @transform_6, window_bounds = array<i64: 1, 1>}, {transform_indices = @transform_7, window_bounds = array<i64: 1, 8>}]} {
    %c0 = arith.constant 0 : index
    %c0_0 = arith.constant 0 : index
    %0 = vector.load %arg1[%c0, %c0_0] : memref<4x8xf32, #tpu.memory_space<vmem>>, vector<4x8xf32>
    %c0_1 = arith.constant 0 : index
    %c0_2 = arith.constant 0 : index
    %1 = vector.load %arg2[%c0_1, %c0_2] : memref<24x4xf32, #tpu.memory_space<vmem>>, vector<24x4xf32>
    %cst = arith.constant dense<0.000000e+00> : vector<24x8xf32>
    %2 = tpu.matmul %1, %0, %cst {dimension_numbers = #tpu.dot_dimension_numbers<[1], [0], [0], [1], [0, 0, 1, 1], [], []>} : vector<24x4xf32>, vector<4x8xf32>, vector<24x8xf32> -> vector<24x8xf32>
    %c0_3 = arith.constant 0 : index
    %c0_4 = arith.constant 0 : index
    %3 = vector.load %arg3[%c0_3, %c0_4] : memref<24x1xf32, #tpu.memory_space<vmem>>, vector<24x1xf32>
    %4 = vector.broadcast %3 : vector<24x1xf32> to vector<24x8xf32>
    %5 = arith.addf %2, %4 : vector<24x8xf32>
    %cst_5 = arith.constant 0.000000e+00 : f32
    %6 = vector.broadcast %cst_5 : f32 to vector<24x8xf32>
    %7 = arith.maximumf %5, %6 : vector<24x8xf32>
    %c0_6 = arith.constant 0 : index
    %c0_7 = arith.constant 0 : index
    %8 = vector.load %arg4[%c0_6, %c0_7] : memref<12x24xf32, #tpu.memory_space<vmem>>, vector<12x24xf32>
    %cst_8 = arith.constant dense<0.000000e+00> : vector<12x8xf32>
    %9 = tpu.matmul %8, %7, %cst_8 {dimension_numbers = #tpu.dot_dimension_numbers<[1], [0], [0], [1], [0, 0, 1, 1], [], []>} : vector<12x24xf32>, vector<24x8xf32>, vector<12x8xf32> -> vector<12x8xf32>
    %c0_9 = arith.constant 0 : index
    %c0_10 = arith.constant 0 : index
    %10 = vector.load %arg5[%c0_9, %c0_10] : memref<12x1xf32, #tpu.memory_space<vmem>>, vector<12x1xf32>
    %11 = vector.broadcast %10 : vector<12x1xf32> to vector<12x8xf32>
    %12 = arith.addf %9, %11 : vector<12x8xf32>
    %cst_11 = arith.constant 0.000000e+00 : f32
    %13 = vector.broadcast %cst_11 : f32 to vector<12x8xf32>
    %14 = arith.maximumf %12, %13 : vector<12x8xf32>
    %c0_12 = arith.constant 0 : index
    %c0_13 = arith.constant 0 : index
    %15 = vector.load %arg6[%c0_12, %c0_13] : memref<1x12xf32, #tpu.memory_space<vmem>>, vector<1x12xf32>
    %cst_14 = arith.constant dense<0.000000e+00> : vector<1x8xf32>
    %16 = tpu.matmul %15, %14, %cst_14 {dimension_numbers = #tpu.dot_dimension_numbers<[1], [0], [0], [1], [0, 0, 1, 1], [], []>} : vector<1x12xf32>, vector<12x8xf32>, vector<1x8xf32> -> vector<1x8xf32>
    %c0_15 = arith.constant 0 : index
    %c0_16 = arith.constant 0 : index
    %17 = vector.load %arg7[%c0_15, %c0_16] : memref<1x1xf32, #tpu.memory_space<vmem>>, vector<1x1xf32>
    %18 = vector.broadcast %17 : vector<1x1xf32> to vector<1x8xf32>
    %19 = arith.addf %16, %18 : vector<1x8xf32>
    %20 = arith.negf %19 : vector<1x8xf32>
    %21 = math.exp %20 : vector<1x8xf32>
    %cst_17 = arith.constant 1.000000e+00 : f32
    %22 = vector.broadcast %cst_17 : f32 to vector<1x8xf32>
    %23 = arith.addf %22, %21 : vector<1x8xf32>
    %24 = arith.divf %22, %23 : vector<1x8xf32>
    %c0_18 = arith.constant 0 : index
    %c0_19 = arith.constant 0 : index
    %25 = vector.load %arg8[%c0_18, %c0_19] : memref<1x8xf32, #tpu.memory_space<vmem>>, vector<1x8xf32>
    tpu.vector_store %arg8[%c0_18, %c0_19], %24 {strides = array<i32>} : memref<1x8xf32, #tpu.memory_space<vmem>>, vector<1x8xf32>,
    return
  }
  func.func @transform_0(%arg0: i32) -> (i32, i32) {
    %c0_i32 = arith.constant 0 : i32
    %c0_i32_0 = arith.constant 0 : i32
    return %c0_i32, %arg0 : i32, i32
  }
  func.func @transform_1(%arg0: i32) -> (i32, i32) {
    %c0_i32 = arith.constant 0 : i32
    %c0_i32_0 = arith.constant 0 : i32
    %c0_i32_1 = arith.constant 0 : i32
    return %c0_i32, %c0_i32_0 : i32, i32
  }
  func.func @transform_2(%arg0: i32) -> (i32, i32) {
    %c0_i32 = arith.constant 0 : i32
    %c0_i32_0 = arith.constant 0 : i32
    %c0_i32_1 = arith.constant 0 : i32
    return %c0_i32, %c0_i32_0 : i32, i32
  }
  func.func @transform_3(%arg0: i32) -> (i32, i32) {
    %c0_i32 = arith.constant 0 : i32
    %c0_i32_0 = arith.constant 0 : i32
    %c0_i32_1 = arith.constant 0 : i32
    return %c0_i32, %c0_i32_0 : i32, i32
  }
  func.func @transform_4(%arg0: i32) -> (i32, i32) {
    %c0_i32 = arith.constant 0 : i32
    %c0_i32_0 = arith.constant 0 : i32
    %c0_i32_1 = arith.constant 0 : i32
    return %c0_i32, %c0_i32_0 : i32, i32
  }
  func.func @transform_5(%arg0: i32) -> (i32, i32) {
    %c0_i32 = arith.constant 0 : i32
    %c0_i32_0 = arith.constant 0 : i32
    %c0_i32_1 = arith.constant 0 : i32
    return %c0_i32, %c0_i32_0 : i32, i32
  }
  func.func @transform_6(%arg0: i32) -> (i32, i32) {
    %c0_i32 = arith.constant 0 : i32
    %c0_i32_0 = arith.constant 0 : i32
    %c0_i32_1 = arith.constant 0 : i32
    return %c0_i32, %c0_i32_0 : i32, i32
  }
  func.func @transform_7(%arg0: i32) -> (i32, i32) {
    %c0_i32 = arith.constant 0 : i32
    %c0_i32_0 = arith.constant 0 : i32
    return %c0_i32, %arg0 : i32, i32
  }
}

</mosaic_0001>

<bundles_post_ra>
// kernel: tpu_custom_call.1
= control target key start
LH: loop header
LB: loop body
LE: loop exit
PB: predicated region body
PF: predicated region fallthrough
CT: control target
= control target key end

     0   :  { %s556_s0 = inlined_call_operand.vmem [shape: f32[4,8], index: 0, kind: input, shape index: {}]   ;;  %s557_s1 = inlined_call_operand.vmem [shape: f32[24,4], index: 1, kind: input, shape index: {}]   ;;  %s558_s2 = inlined_call_operand.vmem [shape: f32[24,1], index: 2, kind: input, shape index: {}]   ;;  %s559_s3 = inlined_call_operand.vmem [shape: f32[12,24], index: 3, kind: input, shape index: {}]   ;;  %s560_s4 = inlined_call_operand.vmem [shape: f32[12,1], index: 4, kind: input, shape index: {}]   ;;  %s561_s5 = inlined_call_operand.vmem [shape: f32[1,12], index: 5, kind: input, shape index: {}]   ;;  %s562_s6 = inlined_call_operand.<no memory space> [shape: f32[1,1], index: 6, kind: input, shape index: {}]   ;;  %s563_s7 = inlined_call_operand.hbm [shape: f32[1,8], index: 7, kind: output, shape index: {}]  }
   0x1   :  { %v12_v0 = vstv %s562_s6 }
   0x2   :  { %13 = vst [vmem:[#allocation2] sm:$0x1] %v12_v0 }
   0x3   :  { %v29_v1 = vld [vmem:[%s556_s0] sm:$0xf]  ;;  %vm61_vm0 = vcmask 1043456   ;;  %v448_v2 = vmov 0.0   ;;  %vm449_vm1 = vmmov 0   ;;  %vm51_vm2 = vcmask 31744  }
   0x4   :  { %377 = vmatprep.subr.mxu0 %v448_v2  ;;  %379 = vmatprep.mubr.msk.f32.mxu0 %vm449_vm1, %v448_v2  ;;  %v30_v3 = vld [vmem:[%s557_s1] sm:$0xff]  ;;  %v450_v4 = vmov 0   ;;  %v35_v6 = vld [vmem:[%s558_s2 + $0x10] sm:$0xff]  ;;  %v31_v7 = vld [vmem:[%s557_s1 + $0x8] sm:$0xff] }
   0x5   :  { %378 = vmatpush3.msk.msra.mxu0 %vm61_vm0, %v29_v1  ;;  %418 = vset.pattern.permute.xlu0 %v450_v4  ;;  %v33_v5 = vld [vmem:[%s558_s2] sm:$0xff]  ;;  %v34_v8 = vld [vmem:[%s558_s2 + $0x8] sm:$0xff] }
   0x6   :  { %380 = vmatmul.mubr.msk.f32.vlgmr.msra.gmra.mrb[0].mxu0 %vm51_vm2, %v30_v3  ;;  %38 = vperm.xlu0 %418, %v33_v5  }
   0x7   :  { %382 = vmatprep.mubr.msk.f32.mxu0 %vm449_vm1, %v448_v2  ;;  %419 = vset.pattern.permute.xlu1 %v450_v4 }
   0x8   :  { %14 = vsyncpa [#allocation4], 0  ;;  %48 = vperm.xlu1 %419, %v35_v6   ;;  %v150_v9 = vld [vmem:[%s560_s4] sm:$0xff]  ;;  %v32_v10 = vld [vmem:[%s557_s1 + $0x10] sm:$0xff]  ;;  %vm162_vm3 = vcmask 195584   ;;  %v451_v31 = vmov 0.0|0.0   ;;  %v253_v42 = vlaneseq }
   0x9   :  { %v151_v11 = vld [vmem:[%s560_s4 + $0x8] sm:$0xf]  ;;  %v247_v12 = vld [vmem:[#allocation2] sm:$0x1]  ;;  %vm452_vm4 = vmmov 1   ;;  %vm257_vm6 = vcmask 97280  }
   0xa   :  { %383 = vmatmul.mubr.msk.f32.gmra.mrb[2].mxu0 %vm51_vm2, %v31_v7  ;;  %43 = vperm.xlu0 %418, %v34_v8   ;;  %v148_v13 = vld [vmem:[%s559_s3] sm:$0xff]  ;;  %v149_v30 = vld [vmem:[%s559_s3 + $0x8] sm:$0xf]  ;;  %vm410_vm5 = vmpackc.low %vm61_vm0, %vm452_vm4  ;;  %v254_v43 = vshrl.u32 %v253_v42, 7  ;;  %s453_s21 = smov [#allocation3]   ;;  %vm340_vm7 = vcmask 57344  }
   0xb   :  { %385 = vmatprep.mubr.msk.f32.mxu0 %vm449_vm1, %v448_v2  ;;  %394 = vmatprep.mubr.msk.f32.mxu1 %vm162_vm3, %v148_v13  ;;  %v246_v41 = vld [vmem:[%s561_s5] sm:$0x1]  ;;  %s348_s22 = sshll.u32 %s453_s21, 4  ;;  %s349_s22 = int_to_ptr.vmem [resolvable:$true] %s348_s22 }
   0xc   :  { %154 = vperm.xlu1 %419, %v150_v9   ;;  %v255_v44 = vsub.s32 0, %v254_v43  ;;  %s424_s5 = scalar_lea.vmem %s349_s22, 16  ;;  %s428_s23 = scalar_lea.vmem %s349_s22, 32 }
   0xd   :  { %p425_p0 = scmp.ne.s32.totalorder %s349_s22, %s424_s5  ;;  %p429_p1 = scmp.lt.s32.totalorder %s349_s22, %s349_s22 }
   0xe   :  { %386 = vmatmul.mubr.msk.f32.gmra.mrb[4].mxu0 %vm51_vm2, %v32_v10  ;;  %159 = vperm.xlu0 %418, %v151_v11   ;;  %p430_p2 = scmp.lt.s32.totalorder %s428_s23, %s424_s5 }
  0x10   :  { %250 = vperm.xlu1 %419, %v247_v12   ;;  %p431_p3 = por %p430_p2, %p429_p1 }
  0x12   :  { %p432_p4 = pnand %p431_p3, %p425_p0 }
  0x85   :  { %v39_v14 = vpop.permute.xlu0 %38 }
  0x87   :  { %v49_v24 = vpop.permute.xlu1 %48 }
  0x89   :  { %v44_v18 = vpop.permute.xlu0 %43 }
  0x8b   :  { %v155_v34 = vpop.permute.xlu1 %154 }
  0x8d   :  { %v160_v32 = vpop.permute.xlu0 %159 }
  0x8f   :  { %v251_v45 = vpop.permute.xlu1 %250 }
  0x90   :  { %v256_v46 = vrot.slane %v251_v45, %v255_v44 }
  0xd9   :  { %v131_v15 = vpop.f32.mrb[0].mxu0 }
  0xda   :  { %v381_v16 = vpop.f32.mrb[1].mxu0  ;;  %v132_v17 = vadd.f32 %v131_v15, %v39_v14 }
  0xdc   :  { %v145_v22 = vmax.f32 %v132_v17, 0.0 }
  0xdd   :  { %v136_v19 = vpop.f32.mrb[2].mxu0 }
  0xde   :  { %v137_v20 = vadd.f32 %v136_v19, %v44_v18  ;;  %v384_v21 = vpop.f32.mrb[3].mxu0 }
  0xe0   :  { %v146_v23 = vmax.f32 %v137_v20, 0.0 }
  0xe1   :  { %v141_v25 = vpop.f32.mrb[4].mxu0 }
  0xe2   :  { %v142_v26 = vadd.f32 %v141_v25, %v49_v24  ;;  %v387_v27 = vpop.f32.mrb[5].mxu0  ;;  %v404_v28 = vpack.c.bf16 %v146_v23, %v145_v22 }
  0xe4   :  { %v147_v29 = vmax.f32 %v142_v26, 0.0  ;;  %405 = vmatprep.subr.bf16.mxu1 %v404_v28 }
  0xe5   :  { %407 = vmatpush3.bf16.msra.mxu1 %v404_v28 }
  0xe6   :  { %392 = vmatprep.subr.mxu1 %v147_v29 }
  0xe9   :  { %393 = vmatpush3.msra.mxu1 %v147_v29 }
  0xea   :  { %395 = vmatmul.mubr.msk.f32.vlgmr.msra.gmra.mrb[0].mxu1 %vm162_vm3, %v149_v30  ;;  %408 = vmatprep.subr.bf16.mxu1 %v451_v31 }
  0xeb   :  { %401 = vmatprep.mubr.msk.f32.mxu1 %vm449_vm1, %v448_v2 }
 0x1bd   :  { %v396_v33 = vpop.f32.mrb[0].mxu1 }
 0x1be   :  { %v241_v35 = vadd.f32 %v396_v33, %v160_v32  ;;  %v235_v36 = vpop.f32.mrb[1].mxu1 }
 0x1bf   :  { %v236_v37 = vadd.f32 %v235_v36, %v155_v34 }
 0x1c0   :  { %v245_v38 = vmax.f32 %v241_v35, 0.0 }
 0x1c1   :  { %v244_v39 = vmax.f32 %v236_v37, 0.0 }
 0x1c3   :  { %v409_v40 = vpack.c.bf16 %v245_v38, %v244_v39 }
 0x1c5   :  { %411 = vmatpush3.bf16.msk.msra.mxu1 %vm410_vm5, %v409_v40 }
 0x1c8   :  { %402 = vmatmul.mubr.msk.f32.vlgmr.msra.gmra.mrb[2].mxu1 %vm257_vm6, %v246_v41 }
 0x29b   :  { %v330_v47 = vpop.f32.mrb[2].mxu1 }
 0x29c   :  { %v331_v48 = vadd.f32 %v330_v47, %v256_v46  ;;  %v403_v49 = vpop.f32.mrb[3].mxu1 }
 0x29e   :  { %v364_v50 = vmul.f32 -1.442695, %v331_v48 }
 0x2a0   :  { %420 = vpow2.f32 %v364_v50 }
 0x2aa   :  { %v421_v51 = vpop.eup %420 }
 0x2ab   :  { %v337_v52 = vadd.f32 1.0, %v421_v51 }
 0x2ad   :  { %422 = vrcp.f32 %v337_v52 }
 0x2b7   :  { %v423_v53 = vpop.eup %422 }
 0x2b8   :  { %341 = vst.msk [vmem:[#allocation3] sm:$0x1] %vm340_vm7, %v423_v53 }
 0x2b9   :  { %435 = shalt.err (!%p432_p4)
}
 0x2ba   :  { %s436_s26 = scalar_lea.hbm %s563_s7, 16 }
 0x2bb   :  { %p437_p5 = scmp.ne.s32.totalorder %s563_s7, %s436_s26  ;;  %p440_p6 = scmp.lt.u32.totalorder %s436_s26, %s563_s7 }
 0x2bd   :  { %p442_p7 = pnand %p440_p6, %p437_p5 }
 0x2bf   :  { %445 = shalt.err (!%p442_p7)
}
 0x2c0   :  { %351 = dma.vmem_to_hbm [thread:$0]  %s349_s22, 16, %s563_s7, [#allocation4]  }
 0x2c1   :  { %446 = dma.done.wait [#allocation4], 16  }
 0x2c2   :  { %447 = vsyncadd [#allocation4], 4294967280 }
 0x2c3   :  { %355 = vsyncpa [#allocation4], 1 }

</bundles_post_ra>
